<compile_context>
chip_gen: v5e
topology: v5e:2x2
jax: 0.10.0
libtpu: 0.0.40
codegen_flags: <defaults>
</compile_context>

<pallas_src>
import functools
import math

import jax
import jax.numpy as jnp
from jax import lax
from jax.experimental import pallas as pl
from jax.experimental.pallas import tpu as pltpu


def _round_up(x, m):
    return (x + m - 1) // m * m


def _vmem_capacity_bytes():
    """Physical per-core VMEM (v5e/v6e: 128 MiB, v7x: 64 MiB); conservative fallback."""
    try:
        return int(pltpu.get_tpu_info().vmem_capacity_bytes)
    except Exception:
        return 64 << 20


def _resident_max_n(Dp, capacity):
    # Solve  2*Np^2 (bf16 G) + 24*Np*Dp (f32 working arrays) + 2 MiB <= 0.7*capacity.
    budget = 0.70 * capacity - float(2 << 20)
    if budget <= 0:
        return 256
    b = 24.0 * Dp
    x = (-b + math.sqrt(b * b + 8.0 * budget)) / 4.0
    return max(256, (int(x) // 128) * 128)


def _tiled_vmem_need(Np, Dp, tm, tk, cur_resident):
    g = 2 * tm * tk * 2                                   # double-buffered bf16 G tiles
    cur_b = 2 * (Np if cur_resident else tk) * Dp * 2     # bf16 cur (resident or streamed)
    rows = 2 * 2 * tm * Dp * 4                            # f32 cur rows + acc rows
    outs = 2 * 2 * tm * Dp * 4                            # two f32 outputs
    scratch = tm * Dp * 4
    return g + cur_b + rows + outs + scratch


def _choose_tiles(N):
    tk = 2048
    while tk > 256 and 8 * tk > N:          # cap zero-padding waste from round_up(N, tk)
        tk //= 2
    tm = 1024
    while tm > 256 and _round_up(N, max(tm, tk)) < 2 * tm:  # keep >=2 row tiles (v7x megacore)
        tm //= 2
    return tm, tk


# --------------------------------------------------------------------------- #
# Path A (small graphs): whole bf16 G resident in VMEM (single-buffered,
# whole-array placement), all layers in ONE kernel -> G read from HBM once.
# --------------------------------------------------------------------------- #
def _propagate_resident_kernel(g_ref, e_ref, out_ref, *, n_layers, residual):
    g = g_ref[...]                       # bf16 (Np, Np), stays resident across layers
    e0 = e_ref[...]                      # f32  (Np, Dp)
    acc = e0
    cur = e0
    for _ in range(n_layers):            # static unroll (n_layers is small)
        side = jnp.dot(g, cur.astype(jnp.bfloat16),
                       preferred_element_type=jnp.float32)
        cur = side + cur if residual else side
        acc = acc + cur
    out_ref[...] = (acc * (1.0 / float(n_layers + 1))).astype(out_ref.dtype)


def _propagate_resident(g_p, e_p, n_layers, residual, vmem_limit_bytes):
    Np, Dp = e_p.shape
    kernel = functools.partial(_propagate_resident_kernel,
                               n_layers=n_layers, residual=residual)
    # Whole-array VMEM placement: single buffered (no grid -> no pipeline buffers).
    return pl.pallas_call(
        kernel,
        out_shape=jax.ShapeDtypeStruct((Np, Dp), jnp.float32),
        in_specs=[pl.BlockSpec(memory_space=pltpu.MemorySpace.VMEM),
                  pl.BlockSpec(memory_space=pltpu.MemorySpace.VMEM)],
        out_specs=pl.BlockSpec(memory_space=pltpu.MemorySpace.VMEM),
        compiler_params=pltpu.CompilerParams(vmem_limit_bytes=vmem_limit_bytes),
    )(g_p, e_p)


# --------------------------------------------------------------------------- #
# Path B (large graphs): per-layer tiled, FUSED kernel
#   side = G @ cur_bf16 ;  new_cur = side (+ cur) ;  acc += new_cur
#   grid = (rows "parallel", K "arbitrary" last), bf16 G tiles, f32 accumulator,
#   residual + running-sum done in the pl.when(k == last) finalize, acc aliased.
# --------------------------------------------------------------------------- #
def _gcn_layer_kernel(g_ref, cb_ref, cf_ref, ai_ref, nc_ref, ao_ref, mm_ref,
                      *, residual, tk, cur_resident):
    k = pl.program_id(1)

    @pl.when(k == 0)
    def _():
        mm_ref[...] = jnp.zeros_like(mm_ref)

    if cur_resident:
        off = pl.multiple_of(k * tk, tk)
        c = cb_ref[pl.ds(off, tk), :]                    # slice of resident bf16 cur
    else:
        c = cb_ref[...]                                  # streamed bf16 cur tile
    mm_ref[...] += jnp.dot(g_ref[...], c, preferred_element_type=jnp.float32)

    @pl.when(k == pl.num_programs(1) - 1)
    def _():
        side = mm_ref[...]
        new_cur = (side + cf_ref[...]) if residual else side
        nc_ref[...] = new_cur
        ao_ref[...] = ai_ref[...] + new_cur              # fused running sum


def _gcn_layer(g_p, cur_b16, cur_f32, acc, *, tm, tk, residual, cur_resident,
               vmem_limit_bytes):
    Np = g_p.shape[0]
    Dp = cur_f32.shape[1]
    grid = (Np // tm, Np // tk)
    if cur_resident:
        cb_spec = pl.BlockSpec((Np, Dp), lambda i, k: (0, 0))     # resident across grid
    else:
        cb_spec = pl.BlockSpec((tk, Dp), lambda i, k: (k, 0))
    kernel = functools.partial(_gcn_layer_kernel, residual=residual, tk=tk,
                               cur_resident=cur_resident)
    cost = pl.CostEstimate(
        flops=2 * Np * Np * Dp,
        transcendentals=0,
        bytes_accessed=Np * Np * g_p.dtype.itemsize + 18 * Np * Dp)

    new_cur, new_acc = pl.pallas_call(
        kernel,
        out_shape=(jax.ShapeDtypeStruct((Np, Dp), jnp.float32),
                   jax.ShapeDtypeStruct((Np, Dp), jnp.float32)),
        grid_spec=pltpu.PrefetchScalarGridSpec(
            num_scalar_prefetch=0,
            grid=grid,
            in_specs=[pl.BlockSpec((tm, tk), lambda i, k: (i, k)),   # G tile (bf16)
                      cb_spec,                                       # cur bf16
                      pl.BlockSpec((tm, Dp), lambda i, k: (i, 0)),   # cur f32 rows
                      pl.BlockSpec((tm, Dp), lambda i, k: (i, 0))],  # acc in rows
            out_specs=[pl.BlockSpec((tm, Dp), lambda i, k: (i, 0)),  # new_cur
                       pl.BlockSpec((tm, Dp), lambda i, k: (i, 0))], # acc out
            scratch_shapes=[pltpu.VMEM((tm, Dp), jnp.float32)],
        ),
        input_output_aliases={3: 1},      # acc updated in place (donated buffer)
        compiler_params=pltpu.CompilerParams(
            dimension_semantics=("parallel", "arbitrary"),
            vmem_limit_bytes=vmem_limit_bytes),
        cost_estimate=cost,
    )(g_p, cur_b16, cur_f32, acc)
    return new_cur, new_acc


def _propagate_tiled(g_p, e_p, n_layers, residual, tm, tk, cur_resident,
                     vmem_limit_bytes):
    cur = e_p
    acc = e_p
    for _ in range(n_layers):
        cur_b16 = cur.astype(jnp.bfloat16)            # one cast per layer (wrapper)
        cur, acc = _gcn_layer(g_p, cur_b16, cur, acc, tm=tm, tk=tk,
                              residual=residual, cur_resident=cur_resident,
                              vmem_limit_bytes=vmem_limit_bytes)
    return acc * (1.0 / float(n_layers + 1))


# --------------------------------------------------------------------------- #
# Full LightGCN.forward(users, items) given the pre-padded graph.
# --------------------------------------------------------------------------- #
def lightgcn_forward(g_p, user_emb, item_emb, users, items, *, n_layers,
                     residual, resident, tm, tk, cur_resident, vmem_limit_bytes):
    n_user = user_emb.shape[0]
    n_item = item_emb.shape[0]
    N = n_user + n_item
    D = user_emb.shape[1]
    Np = g_p.shape[0]
    Dp = max(128, _round_up(D, 128))

    all_emb = jnp.concatenate([user_emb, item_emb], axis=0).astype(jnp.float32)   # t.cat
    e_p = jnp.zeros((Np, Dp), jnp.float32).at[:N, :D].set(all_emb)                 # tiny

    if resident:
        out_p = _propagate_resident(g_p, e_p, n_layers, residual, vmem_limit_bytes)
    else:
        out_p = _propagate_tiled(g_p, e_p, n_layers, residual, tm, tk,
                                 cur_resident, vmem_limit_bytes)

    light_out = out_p[:N, :D]
    all_users = light_out[:n_user]                                   # t.split
    all_items = light_out[n_user:]
    users_emb = all_users[users]
    items_emb = all_items[items]
    # Scoring tail (B*D FLOPs): kept in XLA — a Pallas call here is pure overhead.
    return jnp.sum(users_emb * items_emb, axis=1)


def make_lightgcn_forward(graph, *, embed_size, n_layers=3, residual=False,
                          graph_dtype=jnp.bfloat16, tm=None, tk=None):
    """Pads + casts the normalized adjacency ONCE (hoisted out of the hot path) and
    returns (g_padded, jitted forward(g_padded, user_emb, item_emb, users, items))."""
    N = int(graph.shape[0])
    Dp = max(128, _round_up(embed_size, 128))
    capacity = _vmem_capacity_bytes()
    budget = int(0.70 * capacity)

    forced = (tm is not None) or (tk is not None)
    resident = (not forced) and (N <= _resident_max_n(Dp, capacity))

    if resident:
        Np = _round_up(max(N, 128), 128)
        tm_ = tk_ = None
        cur_resident = False
        need = 2 * Np * Np + 24 * Np * Dp + (2 << 20)
    else:
        if tm is None or tk is None:
            tm_, tk_ = _choose_tiles(N)
        else:
            tm_, tk_ = int(tm), int(tk)
        Np = _round_up(N, tm_ * tk_ // math.gcd(tm_, tk_))
        assert Np % tm_ == 0 and Np % tk_ == 0, (Np, tm_, tk_)
        cur_resident = _tiled_vmem_need(Np, Dp, tm_, tk_, True) <= budget
        need = _tiled_vmem_need(Np, Dp, tm_, tk_, cur_resident)

    vmem_limit = int(min(int(0.75 * capacity), max(need + (8 << 20), 32 << 20)))

    # One-time pad + cast of the dominant HBM stream (never redone per forward).
    # TODO(synk): on v7x, graph_dtype=jnp.float8_e4m3fn would halve the G stream again
    #             (values are in (0,1]); kernels currently assume a bf16 MXU feed.
    g_p = jnp.zeros((Np, Np), graph_dtype).at[:N, :N].set(graph.astype(graph_dtype))
    g_p = jax.block_until_ready(g_p)

    fwd = jax.jit(functools.partial(
        lightgcn_forward, n_layers=n_layers, residual=residual, resident=resident,
        tm=tm_, tk=tk_, cur_resident=cur_resident, vmem_limit_bytes=vmem_limit))
    return g_p, fwd


# --------------------------------------------------------------------------- #
# Pure-JAX references (mirror the PyTorch computer()/forward() semantics).
# --------------------------------------------------------------------------- #
def lightgcn_forward_ref(graph, user_emb, item_emb, users, items,
                         n_layers=3, residual=False, emulate_bf16_graph=False):
    g = graph.astype(jnp.float32)
    if emulate_bf16_graph:
        g = g.astype(jnp.bfloat16).astype(jnp.float32)
    n_user = user_emb.shape[0]
    all_emb = jnp.concatenate([user_emb, item_emb], axis=0).astype(jnp.float32)
    embs = [all_emb]
    cur = all_emb
    for _ in range(n_layers):
        c = cur.astype(jnp.bfloat16).astype(jnp.float32) if emulate_bf16_graph else cur
        side = jnp.dot(g, c, precision=lax.Precision.HIGHEST)
        cur = side + cur if residual else side
        embs.append(cur)
    light_out = jnp.mean(jnp.stack(embs, axis=1), axis=1)
    all_users, all_items = light_out[:n_user], light_out[n_user:]
    return jnp.sum(all_users[users] * all_items[items], axis=1)


# --------------------------------------------------------------------------- #
# Synthetic data (dataset.getSparseGraph() semantics, kept dense).
# --------------------------------------------------------------------------- #
def _make_graph(key, n_user, n_item, density=0.1):
    N = n_user + n_item
    R = (jax.random.uniform(key, (n_user, n_item)) < density).astype(jnp.float32)
    A = jnp.zeros((N, N), dtype=jnp.float32)
    A = A.at[:n_user, n_user:].set(R)
    A = A.at[n_user:, :n_user].set(R.T)
    deg = jnp.sum(A, axis=1)
    d_inv_sqrt = jnp.where(deg > 0, 1.0 / jnp.sqrt(jnp.maximum(deg, 1e-12)), 0.0)
    return d_inv_sqrt[:, None] * A * d_inv_sqrt[None, :]


if __name__ == "__main__":
    key = jax.random.PRNGKey(0)
    k_u, k_i, k_r, k_u2, k_i2, k_r2 = jax.random.split(key, 6)
    embed_size = 32

    # ---------------- Test A: resident-G path (classic small config) --------- #
    n_user, n_item, n_layers, batch = 64, 64, 3, 8
    user_emb = 0.1 * jax.random.normal(k_u, (n_user, embed_size), jnp.float32)
    item_emb = 0.1 * jax.random.normal(k_i, (n_item, embed_size), jnp.float32)
    graph = _make_graph(k_r, n_user, n_item)
    users = jnp.arange(batch, dtype=jnp.int32) % n_user
    items = (jnp.arange(batch, dtype=jnp.int32) * 3 + 1) % n_item

    g_p, fwd_a = make_lightgcn_forward(graph, embed_size=embed_size,
                                       n_layers=n_layers, residual=False)
    scores_a = jax.block_until_ready(fwd_a(g_p, user_emb, item_emb, users, items))

    ref_a_tight = lightgcn_forward_ref(graph, user_emb, item_emb, users, items,
                                       n_layers, False, emulate_bf16_graph=True)
    ref_a_f32 = lightgcn_forward_ref(graph, user_emb, item_emb, users, items,
                                     n_layers, False)
    assert scores_a.shape == (batch,)
    assert jnp.allclose(scores_a, ref_a_tight, atol=1e-4, rtol=1e-4), (scores_a, ref_a_tight)
    assert jnp.allclose(scores_a, ref_a_f32, atol=5e-3, rtol=5e-2), (scores_a, ref_a_f32)

    # ---------------- Test B: fused tiled path (forced small tiles) ---------- #
    n_user2, n_item2, n_layers2, batch2 = 160, 160, 2, 16
    user_emb2 = 0.1 * jax.random.normal(k_u2, (n_user2, embed_size), jnp.float32)
    item_emb2 = 0.1 * jax.random.normal(k_i2, (n_item2, embed_size), jnp.float32)
    graph2 = _make_graph(k_r2, n_user2, n_item2)
    users2 = jnp.arange(batch2, dtype=jnp.int32) % n_user2
    items2 = (jnp.arange(batch2, dtype=jnp.int32) * 7 + 2) % n_item2

    g_p2, fwd_b = make_lightgcn_forward(graph2, embed_size=embed_size,
                                        n_layers=n_layers2, residual=True,
                                        tm=128, tk=128)
    scores_b = jax.block_until_ready(fwd_b(g_p2, user_emb2, item_emb2, users2, items2))

    ref_b_tight = lightgcn_forward_ref(graph2, user_emb2, item_emb2, users2, items2,
                                       n_layers2, True, emulate_bf16_graph=True)
    ref_b_f32 = lightgcn_forward_ref(graph2, user_emb2, item_emb2, users2, items2,
                                     n_layers2, True)
    assert scores_b.shape == (batch2,)
    assert jnp.allclose(scores_b, ref_b_tight, atol=1e-4, rtol=1e-4), (scores_b, ref_b_tight)
    assert jnp.allclose(scores_b, ref_b_f32, atol=5e-3, rtol=5e-2), (scores_b, ref_b_f32)

    print("KERNEL_OK")
</pallas_src>

<mosaic_0001>
module attributes {stable_mosaic.version = 11 : i64} {
  func.func @_propagate_resident_kernel(%arg0: memref<128x128xbf16, #tpu.memory_space<vmem>>, %arg1: memref<128x128xf32, #tpu.memory_space<vmem>>, %arg2: memref<128x128xf32, #tpu.memory_space<vmem>>) attributes {dimension_semantics = [], scalar_prefetch = 0 : i64, scratch_operands = 0 : i64, tpu.core_type = #tpu.core_type<tc>} {
    %c0 = arith.constant 0 : index
    %c0_0 = arith.constant 0 : index
    %0 = vector.load %arg0[%c0, %c0_0] : memref<128x128xbf16, #tpu.memory_space<vmem>>, vector<128x128xbf16>
    %c0_1 = arith.constant 0 : index
    %c0_2 = arith.constant 0 : index
    %1 = vector.load %arg1[%c0_1, %c0_2] : memref<128x128xf32, #tpu.memory_space<vmem>>, vector<128x128xf32>
    %2 = arith.truncf %1 : vector<128x128xf32> to vector<128x128xbf16>
    %cst = arith.constant dense<0.000000e+00> : vector<128x128xf32>
    %3 = tpu.matmul %0, %2, %cst {dimension_numbers = #tpu.dot_dimension_numbers<[1], [0], [0], [1], [0, 0, 1, 1], [], []>} : vector<128x128xbf16>, vector<128x128xbf16>, vector<128x128xf32> -> vector<128x128xf32>
    %4 = arith.addf %1, %3 : vector<128x128xf32>
    %5 = arith.truncf %3 : vector<128x128xf32> to vector<128x128xbf16>
    %cst_3 = arith.constant dense<0.000000e+00> : vector<128x128xf32>
    %6 = tpu.matmul %0, %5, %cst_3 {dimension_numbers = #tpu.dot_dimension_numbers<[1], [0], [0], [1], [0, 0, 1, 1], [], []>} : vector<128x128xbf16>, vector<128x128xbf16>, vector<128x128xf32> -> vector<128x128xf32>
    %7 = arith.addf %4, %6 : vector<128x128xf32>
    %8 = arith.truncf %6 : vector<128x128xf32> to vector<128x128xbf16>
    %cst_4 = arith.constant dense<0.000000e+00> : vector<128x128xf32>
    %9 = tpu.matmul %0, %8, %cst_4 {dimension_numbers = #tpu.dot_dimension_numbers<[1], [0], [0], [1], [0, 0, 1, 1], [], []>} : vector<128x128xbf16>, vector<128x128xbf16>, vector<128x128xf32> -> vector<128x128xf32>
    %10 = arith.addf %7, %9 : vector<128x128xf32>
    %cst_5 = arith.constant 2.500000e-01 : f32
    %11 = vector.broadcast %cst_5 : f32 to vector<128x128xf32>
    %12 = arith.mulf %10, %11 : vector<128x128xf32>
    %c0_6 = arith.constant 0 : index
    %c0_7 = arith.constant 0 : index
    %13 = vector.load %arg2[%c0_6, %c0_7] : memref<128x128xf32, #tpu.memory_space<vmem>>, vector<128x128xf32>
    tpu.vector_store %arg2[%c0_6, %c0_7], %12 {strides = array<i32>} : memref<128x128xf32, #tpu.memory_space<vmem>>, vector<128x128xf32>,
    return
  }
}

</mosaic_0001>

<bundles_post_ra>
// kernel: lightgcn_forward.1
= control target key start
LH: loop header
LB: loop body
LE: loop exit
PB: predicated region body
PF: predicated region fallthrough
CT: control target
= control target key end

     0   :  { %s730_s1 = inlined_call_operand.vmem [shape: f32[128,128], index: 1, kind: input, shape index: {}]   ;;  %s731_s0 = inlined_call_operand.vmem [shape: bf16[128,128], index: 0, kind: input, shape index: {}]   ;;  %s732_s2 = inlined_call_operand.vmem [shape: f32[128,128], index: 2, kind: output, shape index: {}]  }
   0x1   :  { %v428_v0 = vld [vmem:[%s730_s1 + $0x70] sm:$0xff]  ;;  %v433_v1 = vld [vmem:[%s730_s1 + $0x78] sm:$0xff]  ;;  %v438_v2 = vld [vmem:[%s730_s1 + $0x60] sm:$0xff] }
   0x2   :  { %v50_v3 = vpack.c.bf16 %v433_v1, %v428_v0  ;;  %v445_v4 = vld [vmem:[%s730_s1 + $0x68] sm:$0xff]  ;;  %v452_v6 = vld [vmem:[%s730_s1 + $0x50] sm:$0xff]  ;;  %v457_v7 = vld [vmem:[%s730_s1 + $0x58] sm:$0xff] }
   0x3   :  { %v49_v5 = vpack.c.bf16 %v445_v4, %v438_v2  ;;  %v48_v8 = vpack.c.bf16 %v457_v7, %v452_v6  ;;  %v464_v9 = vld [vmem:[%s730_s1 + $0x40] sm:$0xff]  ;;  %v469_v10 = vld [vmem:[%s730_s1 + $0x48] sm:$0xff]  ;;  %v476_v12 = vld [vmem:[%s730_s1 + $0x30] sm:$0xff] }
   0x4   :  { %99 = vmatpush.bf16.msra.mxu0 %v50_v3  ;;  %386 = vmatpush.bf16.msra.mxu3 %v50_v3  ;;  %v47_v11 = vpack.c.bf16 %v469_v10, %v464_v9  ;;  %v481_v13 = vld [vmem:[%s730_s1 + $0x38] sm:$0xff]  ;;  %v488_v15 = vld [vmem:[%s730_s1 + $0x20] sm:$0xff]  ;;  %v493_v16 = vld [vmem:[%s730_s1 + $0x28] sm:$0xff] }
   0x5   :  { %v46_v14 = vpack.c.bf16 %v481_v13, %v476_v12  ;;  %v45_v17 = vpack.c.bf16 %v493_v16, %v488_v15  ;;  %v500_v18 = vld [vmem:[%s730_s1 + $0x10] sm:$0xff]  ;;  %v505_v19 = vld [vmem:[%s730_s1 + $0x18] sm:$0xff]  ;;  %v512_v21 = vld [vmem:[%s730_s1] sm:$0xff] }
   0x6   :  { %v44_v20 = vpack.c.bf16 %v505_v19, %v500_v18  ;;  %v517_v22 = vld [vmem:[%s730_s1 + $0x8] sm:$0xff]  ;;  %v524_v24 = vld [vmem:[%s731_s0] sm:$0xff]  ;;  %v529_v25 = vld [vmem:[%s731_s0 + $0x30] sm:$0xff] }
   0x7   :  { %v43_v23 = vpack.c.bf16 %v517_v22, %v512_v21  ;;  %v536_v26 = vld [vmem:[%s731_s0 + $0x8] sm:$0xff]  ;;  %v541_v27 = vld [vmem:[%s731_s0 + $0x38] sm:$0xff]  ;;  %v548_v28 = vld [vmem:[%s731_s0 + $0x10] sm:$0xff] }
   0x8   :  { %100 = vmatpush.bf16.msra.mxu0 %v49_v5  ;;  %387 = vmatpush.bf16.msra.mxu3 %v49_v5  ;;  %v554_v29 = vld [vmem:[%s731_s0 + $0x18] sm:$0xff]  ;;  %v560_v30 = vld [vmem:[%s731_s0 + $0x20] sm:$0xff]  ;;  %v566_v31 = vld [vmem:[%s731_s0 + $0x28] sm:$0xff] }
   0xc   :  { %101 = vmatpush.bf16.msra.mxu0 %v48_v8  ;;  %388 = vmatpush.bf16.msra.mxu3 %v48_v8 }
  0x10   :  { %102 = vmatpush.bf16.msra.mxu0 %v47_v11  ;;  %389 = vmatpush.bf16.msra.mxu3 %v47_v11 }
  0x14   :  { %103 = vmatpush.bf16.msra.mxu0 %v46_v14  ;;  %390 = vmatpush.bf16.msra.mxu3 %v46_v14 }
  0x18   :  { %104 = vmatpush.bf16.msra.mxu0 %v45_v17  ;;  %391 = vmatpush.bf16.msra.mxu3 %v45_v17 }
  0x1c   :  { %105 = vmatpush.bf16.msra.mxu0 %v44_v20  ;;  %392 = vmatpush.bf16.msra.mxu3 %v44_v20 }
  0x20   :  { %106 = vmatpush.bf16.msra.mxu0 %v43_v23  ;;  %393 = vmatpush.bf16.msra.mxu3 %v43_v23 }
  0x23   :  { %107 = vmatmul.bf16.vlgmr.msra.gmra.mxu0 %v524_v24  ;;  %137 = vmatmul.bf16.vlgmr.msra.gmra.mxu3 %v529_v25 }
  0x33   :  { %112 = vmatmul.bf16.gmra.mxu0 %v536_v26  ;;  %142 = vmatmul.bf16.gmra.mxu3 %v541_v27 }
  0x43   :  { %117 = vmatmul.bf16.gmra.mxu0 %v548_v28 }
  0x53   :  { %122 = vmatmul.bf16.gmra.mxu0 %v554_v29 }
  0x63   :  { %127 = vmatmul.bf16.gmra.mxu0 %v560_v30 }
  0x73   :  { %132 = vmatmul.bf16.gmra.mxu0 %v566_v31 }
  0xa0   :  { %v108_v32 = vpop.f32.mrf.mxu0 }
  0xa1   :  { %v148_v56 = vadd.f32 %v108_v32, %v512_v21 }
  0xa6   :  { %v138_v33 = vpop.f32.mrf.mxu3 }
  0xa7   :  { %v160_v59 = vadd.f32 %v138_v33, %v438_v2 }
  0xa8   :  { %v110_v34 = vpop.f32.mrf.mxu0 }
  0xa9   :  { %v164_v35 = vpack.c.bf16 %v110_v34, %v108_v32  ;;  %v149_v61 = vadd.f32 %v110_v34, %v517_v22 }
  0xae   :  { %v140_v36 = vpop.f32.mrf.mxu3 }
  0xaf   :  { %v170_v44 = vpack.c.bf16 %v140_v36, %v138_v33  ;;  %v161_v8 = vadd.f32 %v140_v36, %v445_v4 }
  0xb0   :  { %v113_v37 = vpop.f32.mrf.mxu0 }
  0xb1   :  { %v150_v14 = vadd.f32 %v113_v37, %v500_v18 }
  0xb6   :  { %v143_v38 = vpop.f32.mrf.mxu3 }
  0xb7   :  { %v162_v2 = vadd.f32 %v143_v38, %v428_v0 }
  0xb8   :  { %v115_v39 = vpop.f32.mrf.mxu0 }
  0xb9   :  { %v165_v40 = vpack.c.bf16 %v115_v39, %v113_v37  ;;  %v151_v22 = vadd.f32 %v115_v39, %v505_v19 }
  0xbe   :  { %v569_v41 = vpop.f32.mrf.mxu3 }
  0xbf   :  { %v171_v42 = vpack.c.bf16 %v569_v41, %v143_v38 }
  0xc0   :  { %v118_v43 = vpop.f32.mrf.mxu0 }
  0xc1   :  { %172 = vmatpush.bf16.msra.mxu1 %v171_v42  ;;  %394 = vmatpush.bf16.msrb.mxu3 %v171_v42  ;;  %v152_v18 = vadd.f32 %v118_v43, %v488_v15 }
  0xc5   :  { %173 = vmatpush.bf16.msra.mxu1 %v170_v44  ;;  %395 = vmatpush.bf16.msrb.mxu3 %v170_v44 }
  0xc8   :  { %v572_v45 = vpop.f32.mrf.mxu0 }
  0xc9   :  { %v166_v55 = vpack.c.bf16 %v572_v45, %v118_v43  ;;  %v153_v19 = vadd.f32 %v572_v45, %v493_v16 }
  0xd0   :  { %v574_v46 = vpop.f32.mrf.mxu0 }
  0xd1   :  { %v154_v42 = vadd.f32 %v574_v46, %v476_v12 }
  0xd8   :  { %v576_v47 = vpop.f32.mrf.mxu0 }
  0xd9   :  { %v167_v54 = vpack.c.bf16 %v576_v47, %v574_v46  ;;  %v155_v44 = vadd.f32 %v576_v47, %v481_v13 }
  0xe0   :  { %v578_v48 = vpop.f32.mrf.mxu0 }
  0xe8   :  { %v580_v49 = vpop.f32.mrf.mxu0 }
  0xe9   :  { %v168_v53 = vpack.c.bf16 %v580_v49, %v578_v48  ;;  %v157_v45 = vadd.f32 %v580_v49, %v469_v10 }
  0xf0   :  { %v582_v50 = vpop.f32.mrf.mxu0 }
  0xf1   :  { %v158_v46 = vadd.f32 %v582_v50, %v452_v6 }
  0xf8   :  { %v584_v51 = vpop.f32.mrf.mxu0 }
  0xf9   :  { %v169_v52 = vpack.c.bf16 %v584_v51, %v582_v50  ;;  %v159_v47 = vadd.f32 %v584_v51, %v457_v7 }
  0xfb   :  { %174 = vmatpush.bf16.msra.mxu1 %v169_v52  ;;  %396 = vmatpush.bf16.msrb.mxu3 %v169_v52 }
  0xff   :  { %175 = vmatpush.bf16.msra.mxu1 %v168_v53  ;;  %397 = vmatpush.bf16.msrb.mxu3 %v168_v53 }
 0x103   :  { %176 = vmatpush.bf16.msra.mxu1 %v167_v54  ;;  %398 = vmatpush.bf16.msrb.mxu3 %v167_v54  ;;  %v156_v54 = vadd.f32 %v578_v48, %v464_v9 }
 0x107   :  { %177 = vmatpush.bf16.msra.mxu1 %v166_v55  ;;  %399 = vmatpush.bf16.msrb.mxu3 %v166_v55 }
 0x10b   :  { %178 = vmatpush.bf16.msra.mxu1 %v165_v40  ;;  %400 = vmatpush.bf16.msrb.mxu3 %v165_v40 }
 0x10f   :  { %179 = vmatpush.bf16.msra.mxu1 %v164_v35  ;;  %401 = vmatpush.bf16.msrb.mxu3 %v164_v35 }
 0x112   :  { %180 = vmatmul.bf16.vlgmr.msra.gmra.mxu1 %v524_v24  ;;  %210 = vmatmul.bf16.vlgmr.msrb.gmra.mxu3 %v529_v25 }
 0x122   :  { %185 = vmatmul.bf16.gmra.mxu1 %v536_v26  ;;  %215 = vmatmul.bf16.gmra.mxu3 %v541_v27 }
 0x132   :  { %190 = vmatmul.bf16.gmra.mxu1 %v548_v28 }
 0x142   :  { %195 = vmatmul.bf16.gmra.mxu1 %v554_v29 }
 0x152   :  { %200 = vmatmul.bf16.gmra.mxu1 %v560_v30 }
 0x162   :  { %205 = vmatmul.bf16.gmra.mxu1 %v566_v31 }
 0x18f   :  { %v181_v57 = vpop.f32.mrf.mxu1 }
 0x190   :  { %v602_v58 = vadd.f32 %v181_v57, %v148_v56 }
 0x195   :  { %v211_v60 = vpop.f32.mrf.mxu3 }
 0x196   :  { %v606_v62 = vadd.f32 %v211_v60, %v160_v59 }
 0x197   :  { %v183_v63 = vpop.f32.mrf.mxu1 }
 0x198   :  { %v608_v3 = vadd.f32 %v183_v63, %v149_v61  ;;  %v237_v5 = vpack.c.bf16 %v183_v63, %v181_v57 }
 0x19d   :  { %v213_v11 = vpop.f32.mrf.mxu3 }
 0x19e   :  { %v612_v17 = vadd.f32 %v213_v11, %v161_v8  ;;  %v243_v0 = vpack.c.bf16 %v213_v11, %v211_v60  ;;  %v163_v8 = vadd.f32 %v569_v41, %v433_v1 }
 0x19f   :  { %v186_v20 = vpop.f32.mrf.mxu1 }
 0x1a0   :  { %v614_v21 = vadd.f32 %v186_v20, %v150_v14 }
 0x1a5   :  { %v216_v23 = vpop.f32.mrf.mxu3 }
 0x1a6   :  { %v618_v32 = vadd.f32 %v216_v23, %v162_v2 }
 0x1a7   :  { %v188_v33 = vpop.f32.mrf.mxu1 }
 0x1a8   :  { %v620_v34 = vadd.f32 %v188_v33, %v151_v22  ;;  %v238_v35 = vpack.c.bf16 %v188_v33, %v186_v20 }
 0x1ad   :  { %v622_v4 = vpop.f32.mrf.mxu3 }
 0x1ae   :  { %v244_v36 = vpack.c.bf16 %v622_v4, %v216_v23  ;;  %v236_v11 = vadd.f32 %v622_v4, %v163_v8 }
 0x1af   :  { %v191_v37 = vpop.f32.mrf.mxu1 }
 0x1b0   :  { %v626_v40 = vadd.f32 %v191_v37, %v152_v18  ;;  %245 = vmatpush.bf16.msra.mxu2 %v244_v36  ;;  %402 = vmatpush.bf16.msra.mxu3 %v244_v36 }
 0x1b4   :  { %246 = vmatpush.bf16.msra.mxu2 %v243_v0  ;;  %403 = vmatpush.bf16.msra.mxu3 %v243_v0 }
 0x1b7   :  { %v193_v38 = vpop.f32.mrf.mxu1 }
 0x1b8   :  { %v630_v39 = vadd.f32 %v193_v38, %v153_v19  ;;  %v239_v49 = vpack.c.bf16 %v193_v38, %v191_v37 }
 0x1bf   :  { %v196_v15 = vpop.f32.mrf.mxu1 }
 0x1c0   :  { %v634_v43 = vadd.f32 %v196_v15, %v154_v42 }
 0x1c7   :  { %v198_v52 = vpop.f32.mrf.mxu1 }
 0x1c8   :  { %v638_v53 = vadd.f32 %v198_v52, %v155_v44  ;;  %v240_v10 = vpack.c.bf16 %v198_v52, %v196_v15 }
 0x1cf   :  { %v201_v55 = vpop.f32.mrf.mxu1 }
 0x1d0   :  { %v642_v16 = vadd.f32 %v201_v55, %v156_v54 }
 0x1d7   :  { %v203_v56 = vpop.f32.mrf.mxu1 }
 0x1d8   :  { %v646_v12 = vadd.f32 %v203_v56, %v157_v45  ;;  %v241_v60 = vpack.c.bf16 %v203_v56, %v201_v55 }
 0x1df   :  { %v206_v57 = vpop.f32.mrf.mxu1 }
 0x1e0   :  { %v650_v13 = vadd.f32 %v206_v57, %v158_v46 }
 0x1e7   :  { %v208_v59 = vpop.f32.mrf.mxu1 }
 0x1e8   :  { %v654_v9 = vadd.f32 %v208_v59, %v159_v47  ;;  %v242_v48 = vpack.c.bf16 %v208_v59, %v206_v57 }
 0x1ea   :  { %247 = vmatpush.bf16.msra.mxu2 %v242_v48  ;;  %404 = vmatpush.bf16.msra.mxu3 %v242_v48 }
 0x1ee   :  { %248 = vmatpush.bf16.msra.mxu2 %v241_v60  ;;  %405 = vmatpush.bf16.msra.mxu3 %v241_v60 }
 0x1f2   :  { %249 = vmatpush.bf16.msra.mxu2 %v240_v10  ;;  %406 = vmatpush.bf16.msra.mxu3 %v240_v10 }
 0x1f6   :  { %250 = vmatpush.bf16.msra.mxu2 %v239_v49  ;;  %407 = vmatpush.bf16.msra.mxu3 %v239_v49 }
 0x1fa   :  { %251 = vmatpush.bf16.msra.mxu2 %v238_v35  ;;  %408 = vmatpush.bf16.msra.mxu3 %v238_v35 }
 0x1fe   :  { %252 = vmatpush.bf16.msra.mxu2 %v237_v5  ;;  %409 = vmatpush.bf16.msra.mxu3 %v237_v5 }
 0x201   :  { %253 = vmatmul.bf16.vlgmr.msra.gmra.mxu2 %v524_v24  ;;  %283 = vmatmul.bf16.vlgmr.msra.gmra.mxu3 %v529_v25 }
 0x211   :  { %258 = vmatmul.bf16.gmra.mxu2 %v536_v26  ;;  %288 = vmatmul.bf16.gmra.mxu3 %v541_v27 }
 0x221   :  { %263 = vmatmul.bf16.gmra.mxu2 %v548_v28 }
 0x231   :  { %268 = vmatmul.bf16.gmra.mxu2 %v554_v29 }
 0x241   :  { %273 = vmatmul.bf16.gmra.mxu2 %v560_v30 }
 0x251   :  { %278 = vmatmul.bf16.gmra.mxu2 %v566_v31 }
 0x284   :  { %v254_v6 = vpop.f32.mrf.mxu2  ;;  %v284_v7 = vpop.f32.mrf.mxu3 }
 0x285   :  { %v294_v50 = vadd.f32 %v254_v6, %v602_v58  ;;  %v306_v24 = vadd.f32 %v284_v7, %v606_v62 }
 0x287   :  { %v310_v51 = vmul.f32 0.25, %v294_v50  ;;  %v322_v25 = vmul.f32 0.25, %v306_v24 }
 0x289   :  { %326 = vst [vmem:[%s732_s2] sm:$0xff] %v310_v51 }
 0x28a   :  { %338 = vst [vmem:[%s732_s2 + $0x60] sm:$0xff] %v322_v25 }
 0x28c   :  { %v256_v26 = vpop.f32.mrf.mxu2  ;;  %v286_v27 = vpop.f32.mrf.mxu3 }
 0x28d   :  { %v295_v28 = vadd.f32 %v256_v26, %v608_v3  ;;  %v307_v29 = vadd.f32 %v286_v27, %v612_v17 }
 0x28f   :  { %v311_v30 = vmul.f32 0.25, %v295_v28  ;;  %v323_v31 = vmul.f32 0.25, %v307_v29 }
 0x291   :  { %327 = vst [vmem:[%s732_s2 + $0x8] sm:$0xff] %v311_v30 }
 0x292   :  { %339 = vst [vmem:[%s732_s2 + $0x68] sm:$0xff] %v323_v31 }
 0x294   :  { %v259_v58 = vpop.f32.mrf.mxu2  ;;  %v289_v61 = vpop.f32.mrf.mxu3 }
 0x295   :  { %v296_v62 = vadd.f32 %v259_v58, %v614_v21  ;;  %v308_v63 = vadd.f32 %v289_v61, %v618_v32 }
 0x297   :  { %v312_v5 = vmul.f32 0.25, %v296_v62  ;;  %v324_v3 = vmul.f32 0.25, %v308_v63 }
 0x299   :  { %328 = vst [vmem:[%s732_s2 + $0x10] sm:$0xff] %v312_v5 }
 0x29a   :  { %340 = vst [vmem:[%s732_s2 + $0x70] sm:$0xff] %v324_v3 }
 0x29c   :  { %v261_v14 = vpop.f32.mrf.mxu2  ;;  %v291_v17 = vpop.f32.mrf.mxu3 }
 0x29d   :  { %v297_v20 = vadd.f32 %v261_v14, %v620_v34  ;;  %v309_v21 = vadd.f32 %v291_v17, %v236_v11 }
 0x29f   :  { %v313_v2 = vmul.f32 0.25, %v297_v20  ;;  %v325_v23 = vmul.f32 0.25, %v309_v21 }
 0x2a1   :  { %329 = vst [vmem:[%s732_s2 + $0x18] sm:$0xff] %v313_v2 }
 0x2a2   :  { %341 = vst [vmem:[%s732_s2 + $0x78] sm:$0xff] %v325_v23 }
 0x2a4   :  { %v264_v1 = vpop.f32.mrf.mxu2 }
 0x2a5   :  { %v298_v41 = vadd.f32 %v264_v1, %v626_v40 }
 0x2a7   :  { %v314_v22 = vmul.f32 0.25, %v298_v41 }
 0x2a9   :  { %330 = vst [vmem:[%s732_s2 + $0x20] sm:$0xff] %v314_v22 }
 0x2ac   :  { %v266_v32 = vpop.f32.mrf.mxu2 }
 0x2ad   :  { %v299_v33 = vadd.f32 %v266_v32, %v630_v39 }
 0x2af   :  { %v315_v34 = vmul.f32 0.25, %v299_v33 }
 0x2b1   :  { %331 = vst [vmem:[%s732_s2 + $0x28] sm:$0xff] %v315_v34 }
 0x2b4   :  { %v269_v35 = vpop.f32.mrf.mxu2 }
 0x2b5   :  { %v300_v4 = vadd.f32 %v269_v35, %v634_v43 }
 0x2b7   :  { %v316_v18 = vmul.f32 0.25, %v300_v4 }
 0x2b9   :  { %332 = vst [vmem:[%s732_s2 + $0x30] sm:$0xff] %v316_v18 }
 0x2bc   :  { %v271_v36 = vpop.f32.mrf.mxu2 }
 0x2bd   :  { %v301_v37 = vadd.f32 %v271_v36, %v638_v53 }
 0x2bf   :  { %v317_v40 = vmul.f32 0.25, %v301_v37 }
 0x2c1   :  { %333 = vst [vmem:[%s732_s2 + $0x38] sm:$0xff] %v317_v40 }
 0x2c4   :  { %v274_v0 = vpop.f32.mrf.mxu2 }
 0x2c5   :  { %v302_v19 = vadd.f32 %v274_v0, %v642_v16 }
 0x2c7   :  { %v318_v38 = vmul.f32 0.25, %v302_v19 }
 0x2c9   :  { %334 = vst [vmem:[%s732_s2 + $0x40] sm:$0xff] %v318_v38 }
 0x2cc   :  { %v276_v39 = vpop.f32.mrf.mxu2 }
 0x2cd   :  { %v303_v42 = vadd.f32 %v276_v39, %v646_v12 }
 0x2cf   :  { %v319_v15 = vmul.f32 0.25, %v303_v42 }
 0x2d1   :  { %335 = vst [vmem:[%s732_s2 + $0x48] sm:$0xff] %v319_v15 }
 0x2d4   :  { %v279_v43 = vpop.f32.mrf.mxu2 }
 0x2d5   :  { %v304_v44 = vadd.f32 %v279_v43, %v650_v13 }
 0x2d7   :  { %v320_v52 = vmul.f32 0.25, %v304_v44 }
 0x2d9   :  { %336 = vst [vmem:[%s732_s2 + $0x50] sm:$0xff] %v320_v52 }
 0x2dc   :  { %v281_v53 = vpop.f32.mrf.mxu2 }
 0x2dd   :  { %v305_v54 = vadd.f32 %v281_v53, %v654_v9 }
 0x2df   :  { %v321_v55 = vmul.f32 0.25, %v305_v54 }
 0x2e1   :  { %337 = vst [vmem:[%s732_s2 + $0x58] sm:$0xff] %v321_v55 }

</bundles_post_ra>
